<compile_context>
chip_gen: v7x
topology: tpu7x:2x2x1
jax: 0.10.0
libtpu: 0.0.40
codegen_flags: <defaults>
</compile_context>

<pallas_src>
import jax
import jax.numpy as jnp
from jax.experimental import pallas as pl
from jax.experimental.pallas import tpu as pltpu


def _pointnet_kernel(x_ref, w1_ref, b1_ref, w2_ref, b2_ref, o_ref):
    # x_ref: (Cin, tl)  channels on sublanes, pixels on lanes
    x = x_ref[...]
    cin, tl = x.shape
    cout = o_ref.shape[0]
    w1 = w1_ref[...]                      # (Cin, Cin), BN1 scale folded in
    w2 = w2_ref[...]                      # (Cout, Cin), BN2 scale folded in

    # Stage 1: conv1 (1x1) + BN1 bias + LeakyReLU(0.2).
    # Unrolled VPU broadcast-FMA over the tiny Cin contraction; the bias
    # initializes the accumulator (single broadcast per grid step).
    h = jnp.broadcast_to(b1_ref[...], (cin, tl)).astype(jnp.float32)
    for c in range(cin):
        h = h + w1[:, c:c + 1] * x[c:c + 1, :]
    h = jnp.maximum(h, 0.2 * h)           # LeakyReLU(0.2), single VPU op

    # Stage 2: conv2 (1x1) + BN2 bias + LeakyReLU(0.2).
    y = jnp.broadcast_to(b2_ref[...], (cout, tl)).astype(jnp.float32)
    for c in range(cin):
        y = y + w2[:, c:c + 1] * h[c:c + 1, :]
    y = jnp.maximum(y, 0.2 * y)

    o_ref[...] = y.astype(o_ref.dtype)


def _choose_tile(N, Cin, Cout, HW, vmem_budget_bytes=24 * 1024 * 1024):
    """Pick the lane tile: largest tile that (a) keeps double-buffered in+out
    tiles under a v7x-safe VMEM budget, (b) leaves >= 2 grid blocks for
    megacore sharding, and (c) needs no padding."""
    per_lane_bytes = 2 * (Cin + Cout) * 4          # double-buffered, f32
    budget_tl = max(128, vmem_budget_bytes // per_lane_bytes)

    def ok(tl):
        return tl <= budget_tl and N * (-(-HW // tl)) >= 2

    # Full extent: contiguous per-sample DMA, always a legal block shape.
    if ok(HW):
        return HW
    # Largest 128-multiple divisor of HW within budget (still no padding).
    start = (min(HW, budget_tl) // 128) * 128
    for tl in range(start, 127, -128):
        if HW % tl == 0 and ok(tl):
            return tl
    # Fallback (rare awkward H*W): 128-aligned tile, wrapper will pad.
    return max(128, (min(budget_tl, HW) // 128) * 128)


def pointnet_embedder(x_nchw, w1, s1, b1, w2, s2, b2, *, tl=None, out_dtype=None):
    """x_nchw: (N, Cin, H, W) float32. Returns (N, Cout, H, W) in out_dtype."""
    N, Cin, H, W = x_nchw.shape
    Cout = w2.shape[0]
    HW = H * W
    if out_dtype is None:
        out_dtype = x_nchw.dtype          # f32 default; pass bf16 to halve writeback

    # Fold BN scale into conv weights (exact, eval mode). Keep only bias in kernel.
    w1f = (s1[:, None] * w1).astype(jnp.float32)       # (Cin, Cin)
    w2f = (s2[:, None] * w2).astype(jnp.float32)       # (Cout, Cin)
    b1c = b1.reshape(Cin, 1).astype(jnp.float32)
    b2c = b2.reshape(Cout, 1).astype(jnp.float32)

    # NCHW is already channel-major: (N, Cin, H*W) is a free reshape, no transpose.
    x3 = x_nchw.reshape(N, Cin, HW)

    if tl is None:
        tl = _choose_tile(N, Cin, Cout, HW)
    HWp = -(-HW // tl) * tl
    if HWp != HW:
        # TODO(synk): pad+slice adds wrapper HBM traffic; only hit for awkward
        # H*W that neither fits one VMEM tile nor has a 128-multiple divisor.
        x3 = jnp.pad(x3, ((0, 0), (0, 0), (0, HWp - HW)))

    grid = (N, HWp // tl)
    out = pl.pallas_call(
        _pointnet_kernel,
        out_shape=jax.ShapeDtypeStruct((N, Cout, HWp), out_dtype),
        grid_spec=pltpu.PrefetchScalarGridSpec(
            num_scalar_prefetch=0,
            grid=grid,
            in_specs=[
                pl.BlockSpec((None, Cin, tl), lambda n, j: (n, 0, j)),  # x pixel tile
                pl.BlockSpec((Cin, Cin), lambda n, j: (0, 0)),          # W1 * s1
                pl.BlockSpec((Cin, 1), lambda n, j: (0, 0)),            # BN1 bias
                pl.BlockSpec((Cout, Cin), lambda n, j: (0, 0)),         # W2 * s2
                pl.BlockSpec((Cout, 1), lambda n, j: (0, 0)),           # BN2 bias
            ],
            out_specs=pl.BlockSpec((None, Cout, tl), lambda n, j: (n, 0, j)),
        ),
        compiler_params=pltpu.CompilerParams(
            dimension_semantics=("parallel", "parallel"),
            # Covers large tiles on v5e (16 MiB default scoped) and stays within
            # the v7x 32 MiB default / 64 MiB physical budget.
            vmem_limit_bytes=32 * 1024 * 1024,
        ),
    )(x3, w1f, b1c, w2f, b2c)

    if HWp != HW:
        out = out[:, :, :HW]
    return out.reshape(N, Cout, H, W)


def _make_params(key, input_dim, output_dim, eps=1e-5):
    """Deterministic synthetic parameters; BN folded into scale/bias (eval mode)."""
    ks = jax.random.split(key, 8)
    # conv weights: PyTorch Conv2d weight shape (out, in, 1, 1) -> squeeze to (out, in)
    w1 = jax.random.normal(ks[0], (input_dim, input_dim), jnp.float32) * 0.1
    w2 = jax.random.normal(ks[1], (output_dim, input_dim), jnp.float32) * 0.1
    # BN1 params / running stats
    g1 = 1.0 + 0.1 * jax.random.normal(ks[2], (input_dim,), jnp.float32)
    beta1 = 0.1 * jax.random.normal(ks[3], (input_dim,), jnp.float32)
    mean1 = 0.05 * jax.random.normal(ks[4], (input_dim,), jnp.float32)
    var1 = jnp.abs(1.0 + 0.1 * jax.random.normal(ks[5], (input_dim,), jnp.float32))
    # BN2 params / running stats
    g2 = 1.0 + 0.1 * jax.random.normal(ks[6], (output_dim,), jnp.float32)
    beta2 = 0.1 * jax.random.normal(ks[7], (output_dim,), jnp.float32)
    mean2 = jnp.zeros((output_dim,), jnp.float32)
    var2 = jnp.ones((output_dim,), jnp.float32)

    s1 = g1 / jnp.sqrt(var1 + eps)
    b1 = beta1 - mean1 * s1
    s2 = g2 / jnp.sqrt(var2 + eps)
    b2 = beta2 - mean2 * s2
    return w1, s1, b1, w2, s2, b2


def _reference(x_nchw, w1, s1, b1, w2, s2, b2):
    """Pure-JAX reference with identical semantics (for a sanity check)."""
    hp = jax.lax.Precision.HIGHEST
    x = jnp.transpose(x_nchw, (0, 2, 3, 1))                      # NHWC
    h = jnp.einsum("nhwc,oc->nhwo", x, w1, precision=hp) * s1 + b1
    h = jnp.where(h >= 0, h, 0.2 * h)
    y = jnp.einsum("nhwc,oc->nhwo", h, w2, precision=hp) * s2 + b2
    y = jnp.where(y >= 0, y, 0.2 * y)
    return jnp.transpose(y, (0, 3, 1, 2))                        # NCHW


if __name__ == "__main__":
    key = jax.random.PRNGKey(0)
    k_x, k_p = jax.random.split(key)

    N, Cin, H, W = 2, 4, 16, 16       # input_dim=4
    Cout = 32                         # output_dim=32

    x = jax.random.normal(k_x, (N, Cin, H, W), jnp.float32)
    w1, s1, b1, w2, s2, b2 = _make_params(k_p, Cin, Cout)

    out = pointnet_embedder(x, w1, s1, b1, w2, s2, b2)
    out = jax.block_until_ready(out)

    ref = _reference(x, w1, s1, b1, w2, s2, b2)
    assert out.shape == (N, Cout, H, W)
    assert jnp.allclose(out, ref, atol=1e-4, rtol=1e-4)

    print("KERNEL_OK")
</pallas_src>

<mosaic_0001>
module attributes {stable_mosaic.version = 11 : i64} {
  func.func @_pointnet_kernel(%arg0: i32, %arg1: i32, %arg2: memref<1x4x256xf32, #tpu.memory_space<vmem>>, %arg3: memref<4x4xf32, #tpu.memory_space<vmem>>, %arg4: memref<4x1xf32, #tpu.memory_space<vmem>>, %arg5: memref<32x4xf32, #tpu.memory_space<vmem>>, %arg6: memref<32x1xf32, #tpu.memory_space<vmem>>, %arg7: memref<1x32x256xf32, #tpu.memory_space<vmem>>) attributes {dimension_semantics = [#tpu.dimension_semantics<parallel>, #tpu.dimension_semantics<parallel>], iteration_bounds = array<i64: 2, 1>, scalar_prefetch = 0 : i64, scratch_operands = 0 : i64, tpu.core_type = #tpu.core_type<tc>, window_params = [{transform_indices = @transform_0, window_bounds = array<i64: 1, 4, 256>}, {pipeline_mode = #tpu.pipeline_mode<synchronous>, transform_indices = @transform_1, window_bounds = array<i64: 4, 4>}, {pipeline_mode = #tpu.pipeline_mode<synchronous>, transform_indices = @transform_2, window_bounds = array<i64: 4, 1>}, {pipeline_mode = #tpu.pipeline_mode<synchronous>, transform_indices = @transform_3, window_bounds = array<i64: 32, 4>}, {pipeline_mode = #tpu.pipeline_mode<synchronous>, transform_indices = @transform_4, window_bounds = array<i64: 32, 1>}, {transform_indices = @transform_5, window_bounds = array<i64: 1, 32, 256>}]} {
    %c0 = arith.constant 0 : index
    %c0_0 = arith.constant 0 : index
    %c0_1 = arith.constant 0 : index
    %0 = vector.load %arg2[%c0, %c0_0, %c0_1] : memref<1x4x256xf32, #tpu.memory_space<vmem>>, vector<1x4x256xf32>
    %1 = vector.shape_cast %0 : vector<1x4x256xf32> to vector<4x256xf32>
    %c0_2 = arith.constant 0 : index
    %c0_3 = arith.constant 0 : index
    %2 = vector.load %arg3[%c0_2, %c0_3] : memref<4x4xf32, #tpu.memory_space<vmem>>, vector<4x4xf32>
    %c0_4 = arith.constant 0 : index
    %c0_5 = arith.constant 0 : index
    %3 = vector.load %arg5[%c0_4, %c0_5] : memref<32x4xf32, #tpu.memory_space<vmem>>, vector<32x4xf32>
    %c0_6 = arith.constant 0 : index
    %c0_7 = arith.constant 0 : index
    %4 = vector.load %arg4[%c0_6, %c0_7] : memref<4x1xf32, #tpu.memory_space<vmem>>, vector<4x1xf32>
    %5 = vector.shape_cast %4 : vector<4x1xf32> to vector<4x1xf32>
    %6 = vector.broadcast %5 : vector<4x1xf32> to vector<4x256xf32>
    %7 = vector.extract_strided_slice %2 {offsets = [0, 0], sizes = [4, 1], strides = [1, 1]} : vector<4x4xf32> to vector<4x1xf32>
    %8 = vector.extract_strided_slice %1 {offsets = [0, 0], sizes = [1, 256], strides = [1, 1]} : vector<4x256xf32> to vector<1x256xf32>
    %9 = vector.broadcast %7 : vector<4x1xf32> to vector<4x256xf32>
    %10 = vector.broadcast %8 : vector<1x256xf32> to vector<4x256xf32>
    %11 = arith.mulf %9, %10 : vector<4x256xf32>
    %12 = arith.addf %6, %11 : vector<4x256xf32>
    %13 = vector.extract_strided_slice %2 {offsets = [0, 1], sizes = [4, 1], strides = [1, 1]} : vector<4x4xf32> to vector<4x1xf32>
    %14 = vector.extract_strided_slice %1 {offsets = [1, 0], sizes = [1, 256], strides = [1, 1]} : vector<4x256xf32> to vector<1x256xf32>
    %15 = vector.broadcast %13 : vector<4x1xf32> to vector<4x256xf32>
    %16 = vector.broadcast %14 : vector<1x256xf32> to vector<4x256xf32>
    %17 = arith.mulf %15, %16 : vector<4x256xf32>
    %18 = arith.addf %12, %17 : vector<4x256xf32>
    %19 = vector.extract_strided_slice %2 {offsets = [0, 2], sizes = [4, 1], strides = [1, 1]} : vector<4x4xf32> to vector<4x1xf32>
    %20 = vector.extract_strided_slice %1 {offsets = [2, 0], sizes = [1, 256], strides = [1, 1]} : vector<4x256xf32> to vector<1x256xf32>
    %21 = vector.broadcast %19 : vector<4x1xf32> to vector<4x256xf32>
    %22 = vector.broadcast %20 : vector<1x256xf32> to vector<4x256xf32>
    %23 = arith.mulf %21, %22 : vector<4x256xf32>
    %24 = arith.addf %18, %23 : vector<4x256xf32>
    %25 = vector.extract_strided_slice %2 {offsets = [0, 3], sizes = [4, 1], strides = [1, 1]} : vector<4x4xf32> to vector<4x1xf32>
    %26 = vector.extract_strided_slice %1 {offsets = [3, 0], sizes = [1, 256], strides = [1, 1]} : vector<4x256xf32> to vector<1x256xf32>
    %27 = vector.broadcast %25 : vector<4x1xf32> to vector<4x256xf32>
    %28 = vector.broadcast %26 : vector<1x256xf32> to vector<4x256xf32>
    %29 = arith.mulf %27, %28 : vector<4x256xf32>
    %30 = arith.addf %24, %29 : vector<4x256xf32>
    %cst = arith.constant 2.000000e-01 : f32
    %31 = vector.broadcast %cst : f32 to vector<4x256xf32>
    %32 = arith.mulf %31, %30 : vector<4x256xf32>
    %33 = arith.maximumf %30, %32 : vector<4x256xf32>
    %c0_8 = arith.constant 0 : index
    %c0_9 = arith.constant 0 : index
    %34 = vector.load %arg6[%c0_8, %c0_9] : memref<32x1xf32, #tpu.memory_space<vmem>>, vector<32x1xf32>
    %35 = vector.shape_cast %34 : vector<32x1xf32> to vector<32x1xf32>
    %36 = vector.broadcast %35 : vector<32x1xf32> to vector<32x256xf32>
    %37 = vector.extract_strided_slice %3 {offsets = [0, 0], sizes = [32, 1], strides = [1, 1]} : vector<32x4xf32> to vector<32x1xf32>
    %38 = vector.extract_strided_slice %33 {offsets = [0, 0], sizes = [1, 256], strides = [1, 1]} : vector<4x256xf32> to vector<1x256xf32>
    %39 = vector.broadcast %37 : vector<32x1xf32> to vector<32x256xf32>
    %40 = vector.broadcast %38 : vector<1x256xf32> to vector<32x256xf32>
    %41 = arith.mulf %39, %40 : vector<32x256xf32>
    %42 = arith.addf %36, %41 : vector<32x256xf32>
    %43 = vector.extract_strided_slice %3 {offsets = [0, 1], sizes = [32, 1], strides = [1, 1]} : vector<32x4xf32> to vector<32x1xf32>
    %44 = vector.extract_strided_slice %33 {offsets = [1, 0], sizes = [1, 256], strides = [1, 1]} : vector<4x256xf32> to vector<1x256xf32>
    %45 = vector.broadcast %43 : vector<32x1xf32> to vector<32x256xf32>
    %46 = vector.broadcast %44 : vector<1x256xf32> to vector<32x256xf32>
    %47 = arith.mulf %45, %46 : vector<32x256xf32>
    %48 = arith.addf %42, %47 : vector<32x256xf32>
    %49 = vector.extract_strided_slice %3 {offsets = [0, 2], sizes = [32, 1], strides = [1, 1]} : vector<32x4xf32> to vector<32x1xf32>
    %50 = vector.extract_strided_slice %33 {offsets = [2, 0], sizes = [1, 256], strides = [1, 1]} : vector<4x256xf32> to vector<1x256xf32>
    %51 = vector.broadcast %49 : vector<32x1xf32> to vector<32x256xf32>
    %52 = vector.broadcast %50 : vector<1x256xf32> to vector<32x256xf32>
    %53 = arith.mulf %51, %52 : vector<32x256xf32>
    %54 = arith.addf %48, %53 : vector<32x256xf32>
    %55 = vector.extract_strided_slice %3 {offsets = [0, 3], sizes = [32, 1], strides = [1, 1]} : vector<32x4xf32> to vector<32x1xf32>
    %56 = vector.extract_strided_slice %33 {offsets = [3, 0], sizes = [1, 256], strides = [1, 1]} : vector<4x256xf32> to vector<1x256xf32>
    %57 = vector.broadcast %55 : vector<32x1xf32> to vector<32x256xf32>
    %58 = vector.broadcast %56 : vector<1x256xf32> to vector<32x256xf32>
    %59 = arith.mulf %57, %58 : vector<32x256xf32>
    %60 = arith.addf %54, %59 : vector<32x256xf32>
    %cst_10 = arith.constant 2.000000e-01 : f32
    %61 = vector.broadcast %cst_10 : f32 to vector<32x256xf32>
    %62 = arith.mulf %61, %60 : vector<32x256xf32>
    %63 = arith.maximumf %60, %62 : vector<32x256xf32>
    %c0_11 = arith.constant 0 : index
    %c0_12 = arith.constant 0 : index
    %c0_13 = arith.constant 0 : index
    %64 = vector.load %arg7[%c0_11, %c0_12, %c0_13] : memref<1x32x256xf32, #tpu.memory_space<vmem>>, vector<1x32x256xf32>
    %65 = vector.shape_cast %64 : vector<1x32x256xf32> to vector<32x256xf32>
    %66 = vector.shape_cast %63 : vector<32x256xf32> to vector<1x32x256xf32>
    tpu.vector_store %arg7[%c0_11, %c0_12, %c0_13], %66 {strides = array<i32>} : memref<1x32x256xf32, #tpu.memory_space<vmem>>, vector<1x32x256xf32>,
    return
  }
  func.func @transform_0(%arg0: i32, %arg1: i32) -> (i32, i32, i32) {
    %c0_i32 = arith.constant 0 : i32
    %c0_i32_0 = arith.constant 0 : i32
    return %arg0, %c0_i32, %arg1 : i32, i32, i32
  }
  func.func @transform_1(%arg0: i32, %arg1: i32) -> (i32, i32) {
    %c0_i32 = arith.constant 0 : i32
    %c0_i32_0 = arith.constant 0 : i32
    %c0_i32_1 = arith.constant 0 : i32
    return %c0_i32, %c0_i32_0 : i32, i32
  }
  func.func @transform_2(%arg0: i32, %arg1: i32) -> (i32, i32) {
    %c0_i32 = arith.constant 0 : i32
    %c0_i32_0 = arith.constant 0 : i32
    %c0_i32_1 = arith.constant 0 : i32
    return %c0_i32, %c0_i32_0 : i32, i32
  }
  func.func @transform_3(%arg0: i32, %arg1: i32) -> (i32, i32) {
    %c0_i32 = arith.constant 0 : i32
    %c0_i32_0 = arith.constant 0 : i32
    %c0_i32_1 = arith.constant 0 : i32
    return %c0_i32, %c0_i32_0 : i32, i32
  }
  func.func @transform_4(%arg0: i32, %arg1: i32) -> (i32, i32) {
    %c0_i32 = arith.constant 0 : i32
    %c0_i32_0 = arith.constant 0 : i32
    %c0_i32_1 = arith.constant 0 : i32
    return %c0_i32, %c0_i32_0 : i32, i32
  }
  func.func @transform_5(%arg0: i32, %arg1: i32) -> (i32, i32, i32) {
    %c0_i32 = arith.constant 0 : i32
    %c0_i32_0 = arith.constant 0 : i32
    return %arg0, %c0_i32, %arg1 : i32, i32, i32
  }
}

</mosaic_0001>

<bundles_post_ra>
// kernel: tpu_custom_call.1
= control target key start
LH: loop header
LB: loop body
LE: loop exit
PB: predicated region body
PF: predicated region fallthrough
CT: control target
= control target key end

     0   :  { %10 = vsyncpa [#allocation3], 0  ;;  %s1093_s0 = inlined_call_operand.vmem [shape: f32[2,4,256], index: 0, kind: input, shape index: {}]   ;;  %s1094_s1 = inlined_call_operand.vmem [shape: f32[4,4], index: 1, kind: input, shape index: {}]   ;;  %s1095_s2 = inlined_call_operand.vmem [shape: f32[4,1], index: 2, kind: input, shape index: {}]   ;;  %s1096_s3 = inlined_call_operand.vmem [shape: f32[32,4], index: 3, kind: input, shape index: {}]   ;;  %s1097_s4 = inlined_call_operand.vmem [shape: f32[32,1], index: 4, kind: input, shape index: {}]   ;;  %s1098_s5 = inlined_call_operand.hbm [shape: f32[2,32,256], index: 5, kind: output, shape index: {}]  }
   0x1   :  { %12 = vsyncpa [#allocation3 + $0x1], 0  ;;  %s887_s18 = smov 0   ;;  %s889_s19 = smov 0  }
   0x2   :  { %s891_s20 = smov 0   ;;  %s893_s21 = smov 0  }
   0x3   :  { %s895_s22 = smov 0   ;;  %s897_s23 = smov 0  }
   0x4 LB: > { %s683_s24 = sadd.s32 4294967295, %s848_s23   ;;  %s684_s25 = sadd.s32 4294967294, %s848_s23   ;;  %s848_s23 = sphi %s897_s23, %s18_s23   ;;  %s844_s22 = sphi %s895_s22, %s1105_s22   ;;  %s840_s21 = sphi %s893_s21, %s1104_s21   ;;  %s836_s20 = sphi %s891_s20, %s1103_s20   ;;  %s832_s19 = sphi %s889_s19, %s1102_s19   ;;  %s828_s18 = sphi %s887_s18, %s1101_s18  }
   0x5   : > { %s30_s26 = sadd.s32 1, %s844_s22  ;;  %s151_s27 = sadd.s32 1, %s836_s20 }
   0x6   : > { %p32_p0 = scmp.ge.s32.totalorder %s30_s26, 2  ;;  %p161_p1 = scmp.ne.s32.totalorder %s836_s20, %s832_s19 }
   0x7   : > { %p162_p2 = scmp.eq.s32.totalorder %s683_s24, 1  ;;  %p167_p3 = scmp.ne.s32.totalorder %s832_s19, %s828_s18 }
   0x8   : > { %s1107_s26 = smov (%p32_p0, %s30_s26), 0  ;;  %p168_p5 = scmp.eq.s32.totalorder %s684_s25, 1 }
   0x9   : > { %p927_p4 = por %p162_p2, %p161_p1  ;;  %s146_s29 = ssub.s32 %s844_s22, %s1107_s26 }
   0xa   : > { %p687_p6 = scmp.ge.s32.totalorder %s848_s23, 1  ;;  %p149_p7 = scmp.eq.s32.totalorder %s146_s29, 0 }
   0xb   : > { %p934_p8 = por %p168_p5, %p167_p3  ;;  %p211_p9 = scmp.lt.s32.totalorder %s848_s23, 3 }
   0xc   : > { %s940_s6 = scalar_select %p149_p7, %s836_s20, %s151_s27  }
   0xd   : > { %p212_p10 = pnand %p687_p6, %p211_p9 }
   0xe   : > { %v255_v0 = vld [vmem:[%s1094_s1] sm:$0xf] (!%p212_p10)  ;;  %v850_v1 = vmov (!%p212_p10), 3   ;;  %v851_v2 = vmov (!%p212_p10), 1   ;;  %v852_v3 = vmov (!%p212_p10), 0   ;;  %v853_v4 = vmov (!%p212_p10), 2  }
   0xf   : > { %215 = sbr.rel (%p212_p10) target bundleno = 228 (0xe4), region = 40  ;;  %761 = vset.pattern.permute.xlu0 (!%p212_p10), %v850_v1  ;;  %759 = vset.pattern.permute.xlu1 (!%p212_p10), %v851_v2  ;;  %v260_v5 = vld [vmem:[%s1095_s2] sm:$0xf] (!%p212_p10)  ;;  %v258_v7 = vld [vmem:[%s1096_s3 + $0x10] sm:$0xff] (!%p212_p10)  ;;  %v257_v8 = vld [vmem:[%s1096_s3 + $0x8] sm:$0xff] (!%p212_p10)  ;;  %p244_p11 = scmp.lt.s32.totalorder (!%p212_p10), %s840_s21, 1  ;;  %v272_v14 = vlaneseq (!%p212_p10) }
  0x10   : > { %347 = vperm.xlu0 (!%p212_p10), %761, %v255_v0   ;;  %295 = vperm.xlu1 (!%p212_p10), %759, %v255_v0   ;;  %v256_v6 = vld [vmem:[%s1096_s3] sm:$0xff] (!%p212_p10)  ;;  %v377_v9 = vld [vmem:[%s1097_s4 + $0x8] sm:$0xff] (!%p212_p10)  ;;  %v259_v10 = vld [vmem:[%s1096_s3 + $0x18] sm:$0xff] (!%p212_p10)  ;;  %s240_s17 = sand.u32 (!%p212_p10), 1, %s832_s19   ;;  %s697_s27 = sshll.u32 (!%p212_p10), %s840_s21, 10 }
  0x11   : > { %v379_v11 = vld [vmem:[%s1097_s4 + $0x18] sm:$0xff] (!%p212_p10)  ;;  %v376_v12 = vld [vmem:[%s1097_s4] sm:$0xff] (!%p212_p10)  ;;  %v378_v13 = vld [vmem:[%s1097_s4 + $0x10] sm:$0xff] (!%p212_p10)  ;;  %v273_v15 = vshrl.u32 (!%p212_p10), %v272_v14, 7  ;;  %s688_s24 = sshll.u32 (!%p212_p10), %s240_s17, 6  ;;  %s1039_s9 = scalar_lea.hbm (!%p212_p10), %s1098_s5, %s697_s27 }
  0x12   : > { %s1018_s25 = scalar_lea.vmem (!%p212_p10), [#allocation2], %s688_s24  ;;  %s854_s11 = smov (!%p212_p10), [#allocation2]  }
  0x13   : > { %v274_v16 = vsub.s32 (!%p212_p10), 0, %v273_v15  ;;  %v278_v17 = vsub.s32 (!%p212_p10), 4, %v273_v15  ;;  %v977_v21 = vsub.s32 (!%p212_p10), 1, %v273_v15  ;;  %v304_v22 = vsub.s32 (!%p212_p10), 5, %v273_v15  ;;  %s604_s29 = sshll.u32 (!%p212_p10), %s1018_s25, 4  ;;  %s1041_s29 = int_to_ptr.vmem [resolvable:$true] %s604_s29 }
  0x14   : > { %762 = vset.pattern.permute.xlu0 (!%p212_p10), %v852_v3  ;;  %760 = vset.pattern.permute.xlu1 (!%p212_p10), %v853_v4  ;;  %v326_v29 = vsub.s32 (!%p212_p10), 2, %v273_v15  ;;  %v330_v30 = vsub.s32 (!%p212_p10), 6, %v273_v15  ;;  %v980_v31 = vsub.s32 (!%p212_p10), 3, %v273_v15  ;;  %v356_v32 = vsub.s32 (!%p212_p10), 7, %v273_v15  ;;  %s770_s10 = scalar_lea.vmem (!%p212_p10), %s1041_s29, 1024 }
  0x15   : > { %268 = vperm.xlu0 (!%p212_p10), %762, %v255_v0   ;;  %321 = vperm.xlu1 (!%p212_p10), %760, %v255_v0   ;;  %p771_p12 = scmp.ne.s32.totalorder (!%p212_p10), %s1041_s29, %s770_s10 }
  0x16   : > { %s245_s12 = scalar_select %p244_p11, %s840_s21, 1 }
  0x17   : > { %s1047_s21 = scalar_lea.sflag [#allocation3], %s240_s17  ;;  %p772_p13 = pnand %p771_p12, %p927_p4 }
  0x18   : > { %s696_s13 = sshll.u32 %s245_s12, 3  ;;  %s774_s12 = sshll.u32 %s854_s11, 4  ;;  %s775_s12 = int_to_ptr.vmem [resolvable:$false] %s774_s12 }
  0x19   : > { %263 = vperm.xlu0 %762, %v260_v5   ;;  %763 = vset.pattern.permute.xlu1 %v852_v3  ;;  %s251_s16 = scalar_lea.vmem %s1093_s0, %s696_s13  ;;  %p773_p0 = pneg %p772_p13 }
  0x1a   : > { %402 = vperm.xlu1 %763, %v256_v6   ;;  %v254_v18 = vld [vmem:[%s251_s16] sm:$0xff]  ;;  %s776_s13 = scalar_lea.vmem %s775_s12, 2048  ;;  %p777_p1 = scmp.lt.s32.totalorder %s1041_s29, %s775_s12 }
  0x1b   : > { %v275_v19 = vrot.slane %v254_v18, %v274_v16  ;;  %v279_v20 = vrot.slane %v254_v18, %v278_v17  ;;  %v301_v27 = vrot.slane %v254_v18, %v977_v21  ;;  %v305_v28 = vrot.slane %v254_v18, %v304_v22  ;;  %p778_p2 = scmp.lt.s32.totalorder %s776_s13, %s770_s10 }
  0x1c   : > { %v327_v39 = vrot.slane %v254_v18, %v326_v29  ;;  %v331_v40 = vrot.slane %v254_v18, %v330_v30  ;;  %v353_v41 = vrot.slane %v254_v18, %v980_v31  ;;  %v357_v42 = vrot.slane %v254_v18, %v356_v32 }
  0x1d   : > { %412 = vperm.xlu0 %762, %v258_v7   ;;  %v285_v25 = vrot.slane %v275_v19, %v274_v16  ;;  %v289_v26 = vrot.slane %v279_v20, %v274_v16  ;;  %v311_v37 = vrot.slane %v301_v27, %v977_v21  ;;  %v315_v38 = vrot.slane %v305_v28, %v977_v21  ;;  %p779_p3 = por %p778_p2, %p777_p1 }
  0x1e   : > { %407 = vperm.xlu1 %763, %v257_v8   ;;  %v337_v49 = vrot.slane %v327_v39, %v326_v29  ;;  %v341_v50 = vrot.slane %v331_v40, %v326_v29  ;;  %v363_v51 = vrot.slane %v353_v41, %v980_v31  ;;  %v367_v52 = vrot.slane %v357_v42, %v980_v31 }
  0x1f   : > { %p780_p5 = pnand %p779_p3, %p773_p0 }
  0x21   : > { %387 = vperm.xlu0 %762, %v377_v9  }
  0x22   : > { %417 = vperm.xlu1 %763, %v259_v10  }
  0x25   : > { %397 = vperm.xlu0 %762, %v379_v11  }
  0x26   : > { %382 = vperm.xlu1 %763, %v376_v12  }
  0x29   : > { %765 = vset.pattern.permute.xlu0 %v851_v2 }
  0x2a   : > { %449 = vperm.xlu0 %765, %v257_v8   ;;  %392 = vperm.xlu1 %763, %v378_v13  }
  0x2e   : > { %766 = vset.pattern.permute.xlu0 %v853_v4  ;;  %764 = vset.pattern.permute.xlu1 %v851_v2 }
  0x2f   : > { %485 = vperm.xlu0 %766, %v256_v6   ;;  %445 = vperm.xlu1 %764, %v256_v6  }
  0x33   : > { %497 = vperm.xlu0 %766, %v259_v10   ;;  %453 = vperm.xlu1 %764, %v258_v7  }
  0x37   : > { %769 = vset.pattern.permute.xlu0 %v850_v1  ;;  %457 = vperm.xlu1 %764, %v259_v10  }
  0x38   : > { %529 = vperm.xlu0 %769, %v257_v8  }
  0x3b   : > { %767 = vset.pattern.permute.xlu1 %v853_v4 }
  0x3c   : > { %489 = vperm.xlu1 %767, %v257_v8  }
  0x40   : > { %493 = vperm.xlu1 %767, %v258_v7  }
  0x44   : > { %768 = vset.pattern.permute.xlu1 %v850_v1 }
  0x45   : > { %525 = vperm.xlu1 %768, %v256_v6  }
  0x49   : > { %533 = vperm.xlu1 %768, %v258_v7  }
  0x4d   : > { %537 = vperm.xlu1 %768, %v259_v10  }
  0x8f   : > { %v296_v23 = vpop.permute.xlu1 %295  ;;  %v348_v24 = vpop.permute.xlu0 %347 }
  0x90   : > { %v316_v47 = vmul.f32 %v311_v37, %v296_v23  ;;  %v317_v48 = vmul.f32 %v315_v38, %v296_v23  ;;  %v368_v59 = vmul.f32 %v363_v51, %v348_v24  ;;  %v369_v60 = vmul.f32 %v367_v52, %v348_v24 }
  0x94   : > { %v269_v33 = vpop.permute.xlu0 %268  ;;  %v322_v34 = vpop.permute.xlu1 %321 }
  0x95   : > { %v290_v35 = vmul.f32 %v285_v25, %v269_v33  ;;  %v291_v36 = vmul.f32 %v289_v26, %v269_v33  ;;  %v342_v57 = vmul.f32 %v337_v49, %v322_v34  ;;  %v343_v58 = vmul.f32 %v341_v50, %v322_v34 }
  0x98   : > { %v264_v43 = vpop.permute.xlu0 %263 }
  0x99   : > { %v292_v44 = vadd.f32 %v290_v35, %v264_v43  ;;  %v293_v45 = vadd.f32 %v291_v36, %v264_v43  ;;  %v403_v46 = vpop.permute.xlu1 %402 }
  0x9b   : > { %v318_v53 = vadd.f32 %v316_v47, %v292_v44  ;;  %v319_v54 = vadd.f32 %v317_v48, %v293_v45 }
  0x9c   : > { %v413_v55 = vpop.permute.xlu0 %412 }
  0x9d   : > { %v408_v56 = vpop.permute.xlu1 %407  ;;  %v344_v61 = vadd.f32 %v342_v57, %v318_v53  ;;  %v345_v62 = vadd.f32 %v343_v58, %v319_v54 }
  0x9f   : > { %v370_v1 = vadd.f32 %v368_v59, %v344_v61  ;;  %v371_v2 = vadd.f32 %v369_v60, %v345_v62 }
  0xa0   : > { %v388_v63 = vpop.permute.xlu0 %387 }
  0xa1   : > { %v418_v0 = vpop.permute.xlu1 %417  ;;  %v372_v5 = vmul.f32 0.2, %v370_v1  ;;  %v373_v6 = vmul.f32 0.2, %v371_v2 }
  0xa3   : > { %v374_v9 = vmax.f32 %v370_v1, %v372_v5  ;;  %v375_v10 = vmax.f32 %v371_v2, %v373_v6 }
  0xa4   : > { %v987_v3 = vpop.permute.xlu0 %397 }
  0xa5   : > { %v383_v4 = vpop.permute.xlu1 %382  ;;  %v423_v13 = vrot.slane %v374_v9, %v274_v16  ;;  %v427_v14 = vrot.slane %v375_v10, %v274_v16  ;;  %v463_v20 = vrot.slane %v374_v9, %v977_v21  ;;  %v467_v22 = vrot.slane %v375_v10, %v977_v21 }
  0xa6   : > { %v993_v28 = vrot.slane %v374_v9, %v326_v29  ;;  %v995_v30 = vrot.slane %v375_v10, %v326_v29  ;;  %v998_v34 = vrot.slane %v374_v9, %v980_v31  ;;  %v1001_v35 = vrot.slane %v375_v10, %v980_v31 }
  0xa7   : > { %v430_v17 = vmul.f32 %v423_v13, %v408_v56  ;;  %v431_v18 = vmul.f32 %v427_v14, %v408_v56  ;;  %v428_v16 = vmul.f32 %v423_v13, %v403_v46  ;;  %v429_v32 = vmul.f32 %v427_v14, %v403_v46 }
  0xa8   : > { %v432_v40 = vmul.f32 %v423_v13, %v413_v55  ;;  %v433_v29 = vmul.f32 %v427_v14, %v413_v55  ;;  %v434_v49 = vmul.f32 %v423_v13, %v418_v0  ;;  %v435_v50 = vmul.f32 %v427_v14, %v418_v0 }
  0xa9   : > { %v450_v7 = vpop.permute.xlu0 %449  ;;  %v393_v8 = vpop.permute.xlu1 %392  ;;  %v438_v24 = vadd.f32 %v430_v17, %v388_v63  ;;  %v439_v25 = vadd.f32 %v431_v18, %v388_v63  ;;  %v436_v46 = vadd.f32 %v428_v16, %v383_v4  ;;  %v437_v47 = vadd.f32 %v429_v32, %v383_v4 }
  0xaa   : > { %v470_v26 = vmul.f32 %v463_v20, %v450_v7  ;;  %v471_v27 = vmul.f32 %v467_v22, %v450_v7  ;;  %v440_v53 = vadd.f32 %v432_v40, %v393_v8  ;;  %v441_v54 = vadd.f32 %v433_v29, %v393_v8 }
  0xab   : > { %v443_v13 = vadd.f32 %v435_v50, %v987_v3 }
  0xac   : > { %v478_v36 = vadd.f32 %v470_v26, %v438_v24  ;;  %v479_v37 = vadd.f32 %v471_v27, %v439_v25 }
  0xae   : > { %v446_v11 = vpop.permute.xlu1 %445  ;;  %v486_v12 = vpop.permute.xlu0 %485 }
  0xaf   : > { %v468_v41 = vmul.f32 %v463_v20, %v446_v11  ;;  %v469_v42 = vmul.f32 %v467_v22, %v446_v11  ;;  %v508_v61 = vmul.f32 %v993_v28, %v486_v12  ;;  %v509_v62 = vmul.f32 %v995_v30, %v486_v12 }
  0xb0   : > { %v442_v11 = vadd.f32 %v434_v49, %v987_v3 }
  0xb1   : > { %v476_v55 = vadd.f32 %v468_v41, %v436_v46  ;;  %v477_v56 = vadd.f32 %v469_v42, %v437_v47 }
  0xb2   : > { %v454_v15 = vpop.permute.xlu1 %453  ;;  %v989_v19 = vpop.permute.xlu0 %497 }
  0xb3   : > { %v472_v57 = vmul.f32 %v463_v20, %v454_v15  ;;  %v473_v58 = vmul.f32 %v467_v22, %v454_v15  ;;  %v516_v7 = vadd.f32 %v508_v61, %v476_v55  ;;  %v517_v8 = vadd.f32 %v509_v62, %v477_v56 }
  0xb4   : > { %v514_v16 = vmul.f32 %v993_v28, %v989_v19  ;;  %v515_v32 = vmul.f32 %v995_v30, %v989_v19 }
  0xb5   : > { %v480_v12 = vadd.f32 %v472_v57, %v440_v53  ;;  %v481_v14 = vadd.f32 %v473_v58, %v441_v54 }
  0xb6   : > { %v458_v23 = vpop.permute.xlu1 %457 }
  0xb7   : > { %v530_v33 = vpop.permute.xlu0 %529  ;;  %v474_v63 = vmul.f32 %v463_v20, %v458_v23  ;;  %v475_v1 = vmul.f32 %v467_v22, %v458_v23 }
  0xb8   : > { %v550_v43 = vmul.f32 %v998_v34, %v530_v33  ;;  %v551_v44 = vmul.f32 %v1001_v35, %v530_v33 }
  0xb9   : > { %v482_v18 = vadd.f32 %v474_v63, %v442_v11  ;;  %v483_v20 = vadd.f32 %v475_v1, %v443_v13 }
  0xbb   : > { %v490_v21 = vpop.permute.xlu1 %489  ;;  %v523_v40 = vadd.f32 %v515_v32, %v483_v20 }
  0xbc   : > { %v510_v38 = vmul.f32 %v993_v28, %v490_v21  ;;  %v511_v39 = vmul.f32 %v995_v30, %v490_v21 }
  0xbe   : > { %v518_v45 = vadd.f32 %v510_v38, %v478_v36  ;;  %v519_v31 = vadd.f32 %v511_v39, %v479_v37  ;;  %v522_v39 = vadd.f32 %v514_v16, %v482_v18 }
  0xbf   : > { %v494_v48 = vpop.permute.xlu1 %493 }
  0xc0   : > { %v558_v51 = vadd.f32 %v550_v43, %v518_v45  ;;  %v559_v52 = vadd.f32 %v551_v44, %v519_v31  ;;  %v512_v4 = vmul.f32 %v993_v28, %v494_v48  ;;  %v513_v5 = vmul.f32 %v995_v30, %v494_v48 }
  0xc2   : > { %v566_v59 = vmul.f32 0.2, %v558_v51  ;;  %v567_v60 = vmul.f32 0.2, %v559_v52  ;;  %v520_v22 = vadd.f32 %v512_v4, %v480_v12  ;;  %v521_v23 = vadd.f32 %v513_v5, %v481_v14 }
  0xc4   : > { %v574_v2 = vmax.f32 %v558_v51, %v566_v59  ;;  %v575_v0 = vmax.f32 %v559_v52, %v567_v60  ;;  %v526_v6 = vpop.permute.xlu1 %525 }
  0xc5   : > { %v548_v9 = vmul.f32 %v998_v34, %v526_v6  ;;  %v549_v10 = vmul.f32 %v1001_v35, %v526_v6 }
  0xc6   : > { %582 = vst [vmem:[%s1018_s25 + $0x10] sm:$0xff] %v574_v2  ;;  %583 = vst [vmem:[%s1018_s25 + $0x18] sm:$0xff] %v575_v0 }
  0xc7   : > { %v556_v15 = vadd.f32 %v548_v9, %v516_v7  ;;  %v557_v17 = vadd.f32 %v549_v10, %v517_v8 }
  0xc8   : > { %v534_v24 = vpop.permute.xlu1 %533 }
  0xc9   : > { %v564_v25 = vmul.f32 0.2, %v556_v15  ;;  %v565_v26 = vmul.f32 0.2, %v557_v17  ;;  %v552_v3 = vmul.f32 %v998_v34, %v534_v24  ;;  %v553_v27 = vmul.f32 %v1001_v35, %v534_v24 }
  0xcb   : > { %v572_v33 = vmax.f32 %v556_v15, %v564_v25  ;;  %v573_v21 = vmax.f32 %v557_v17, %v565_v26  ;;  %v560_v36 = vadd.f32 %v552_v3, %v520_v22  ;;  %v561_v37 = vadd.f32 %v553_v27, %v521_v23 }
  0xcc   : > { %v538_v38 = vpop.permute.xlu1 %537 }
  0xcd   : > { %580 = vst [vmem:[%s1018_s25] sm:$0xff] %v572_v33  ;;  %581 = vst [vmem:[%s1018_s25 + $0x8] sm:$0xff] %v573_v21  ;;  %v568_v29 = vmul.f32 0.2, %v560_v36  ;;  %v569_v41 = vmul.f32 0.2, %v561_v37  ;;  %v554_v28 = vmul.f32 %v998_v34, %v538_v38  ;;  %v555_v19 = vmul.f32 %v1001_v35, %v538_v38 }
  0xcf   : > { %v576_v30 = vmax.f32 %v560_v36, %v568_v29  ;;  %v577_v42 = vmax.f32 %v561_v37, %v569_v41  ;;  %v562_v43 = vadd.f32 %v554_v28, %v522_v39  ;;  %v563_v44 = vadd.f32 %v555_v19, %v523_v40 }
  0xd1   : > { %584 = vst [vmem:[%s1018_s25 + $0x20] sm:$0xff] %v576_v30  ;;  %585 = vst [vmem:[%s1018_s25 + $0x28] sm:$0xff] %v577_v42  ;;  %v570_v45 = vmul.f32 0.2, %v562_v43  ;;  %v571_v31 = vmul.f32 0.2, %v563_v44 }
  0xd3   : > { %v578_v34 = vmax.f32 %v562_v43, %v570_v45  ;;  %v579_v35 = vmax.f32 %v563_v44, %v571_v31 }
  0xd5   : > { %586 = vst [vmem:[%s1018_s25 + $0x30] sm:$0xff] %v578_v34  ;;  %587 = vst [vmem:[%s1018_s25 + $0x38] sm:$0xff] %v579_v35 }
  0xd6   : > { %783 = shalt.err (!%p780_p5)
}
  0xd7   : > { %s784_s14 = scalar_lea.hbm %s1039_s9, 1024  ;;  %s788_s17 = scalar_lea.hbm %s1098_s5, 2048 }
  0xd8   : > { %p785_p6 = scmp.ne.s32.totalorder %s1039_s9, %s784_s14  ;;  %p789_p10 = scmp.lt.u32.totalorder %s1039_s9, %s1098_s5 }
  0xd9   : > { %p790_p11 = scmp.lt.u32.totalorder %s788_s17, %s784_s14  ;;  %p792_p13 = scmp.lt.u32.totalorder %s784_s14, %s1039_s9 }
  0xda   : > { %p786_p7 = pnand %p785_p6, %p927_p4 }
  0xdb   : > { %p791_p12 = por %p790_p11, %p789_p10 }
  0xdc   : > { %p787_p9 = pneg %p786_p7 }
  0xdd   : > { %p793_p0 = por %p792_p13, %p791_p12 }
  0xdf   : > { %p794_p1 = pnand %p793_p0, %p787_p9 }
  0xe1   : > { %797 = shalt.err (!%p794_p1)
}
  0xe2   : > { %s855_s27 = smov 256   ;;  %s856_s7 = smov 16  }
  0xe3   : > { %698 = dma.vmem_to_hbm [thread:$0]  (%p927_p4), %s1041_s29, 1024, %s1039_s9, %s1047_s21, %s855_s27, %s855_s27, %s856_s7  }
  0xe4 PF: > { %p704_p2 = scmp.ge.s32.totalorder %s848_s23, 2  ;;  %s619_s8 = sand.u32 1, %s828_s18  }
  0xe5   : > { %s620_s10 = scalar_lea.sflag [#allocation3], %s619_s8 }
  0xe6   : > { %p701_p3 = pnand %p704_p2, %p934_p8 }
  0xe8   : > { %823 = dma.done.wait (!%p701_p3), %s620_s10, 1024  }
  0xe9   : > { %825 = vsyncadd (!%p701_p3), %s620_s10, 4294966272  ;;  %s18_s23 = sadd.s32 1, %s848_s23   ;;  %s1101_s18 = smov %s832_s19 }
  0xea   : > { %p15_p5 = scmp.ge.s32.totalorder %s18_s23, 4   ;;  %s1102_s19 = smov %s836_s20 }
  0xeb   : > { %s1103_s20 = smov %s940_s6  ;;  %s1104_s21 = smov %s844_s22 }
  0xec   : > { %s1105_s22 = smov %s1107_s26  ;;  %17 = sbr.rel (!%p15_p5) target bundleno = 4 (0x4), region = 75 }
  0xf3   :  { %625 = vsyncpa [#allocation3], 1 }
  0xf4   :  { %627 = vsyncpa [#allocation3 + $0x1], 1 }

</bundles_post_ra>
